<compile_context>
chip_gen: v7x
topology: tpu7x:2x2x1
jax: 0.10.0
libtpu: 0.0.40
codegen_flags: <defaults>
</compile_context>

<pallas_src>
import functools

import jax
import jax.numpy as jnp
from jax.experimental import pallas as pl
from jax.experimental.pallas import tpu as pltpu

# ---- Config (from the PyTorch module) --------------------------------------
NUM_BINS = 64
FIRST_BREAK = 2.0
LAST_BREAK = 22.0
MAX_REL = 32
PAIR_CHANNEL = 32
N_BASE = 4
NUM_REL = 2 * MAX_REL + 1   # 65
LANES = 2 * NUM_BINS        # 128  (two j columns packed per output row)
K2 = 2 * NUM_REL            # 130  (two-hot width for the packed matmul)


# ---- Pallas kernel ----------------------------------------------------------
def _pair_logits_kernel(a_row_ref, a_col_ref, s2_ref, out_ref, *, ti, tjh):
    """out[r, cp, h*64+b] = A[i0+r, b] + A[j0+2*cp+h, b] + S[clip(i-j+32,0,64), b]."""
    i0 = pl.program_id(0) * ti
    j0 = pl.program_id(1) * (2 * tjh)

    # Unclipped relative position (plus MAX_REL) for h = 0 of each column pair.
    rr = jax.lax.broadcasted_iota(jnp.int32, (ti, tjh), 0)
    cc = jax.lax.broadcasted_iota(jnp.int32, (ti, tjh), 1)
    t0 = (i0 - j0 + MAX_REL) + rr - 2 * cc
    d0 = jnp.clip(t0, 0, 2 * MAX_REL)                  # hit lane in [0, 65)   (h = 0)
    d1 = jnp.clip(t0 - 1, 0, 2 * MAX_REL) + NUM_REL    # hit lane in [65, 130) (h = 1)

    # bf16 "two-hot": exactly one hit in each half of the 130 lanes.
    lane = jax.lax.broadcasted_iota(jnp.int32, (ti, tjh, K2), 2)
    two_hot = ((d0[:, :, None] == lane).astype(jnp.bfloat16)
               + (d1[:, :, None] == lane).astype(jnp.bfloat16))

    # (ti*tjh, 130) @ blockdiag(S, S) (130, 128): relpos term for both packed columns.
    rel = jnp.dot(two_hot.reshape(ti * tjh, K2), s2_ref[...],
                  preferred_element_type=jnp.float32)

    out_ref[...] = (rel.reshape(ti, tjh, LANES)
                    + a_row_ref[...][:, None, :]      # A[i]   (duplicated over the 2 packed j's)
                    + a_col_ref[...][None, :, :])     # A[j]   (2 consecutive j's packed in lanes)


# ---- Wrapper ----------------------------------------------------------------
def _pick_tile(n, candidates):
    for c in candidates:
        if n % c == 0:
            return c
    return n


def relpos_distohead_forward(seq, y_feat, params, *, ti=None, tj=None):
    """Returns dict(logits=(N,N,NUM_BINS) f32, bin_edges=(NUM_BINS-1,) f32)."""
    del y_feat  # unused in forward (only consumed by DistogramHead.loss)
    n = seq.shape[0]
    # TODO(synk): odd n would need one column of padding on the packed-j axis.
    assert n % 2 == 0, "sequence length must be even"
    wl, bl, wr, br, wrp, brp, wh, bh = params

    # ---- tiny precompute in plain XLA (exact restructuring) ----
    x = jax.nn.one_hot(seq.astype(jnp.int32), N_BASE, dtype=jnp.float32)        # (n, 4)
    a = (x @ (wl + wr) + (bl + br)) @ wh + bh                                   # (n, 64)
    s = (wrp + wrp[::-1] + 2.0 * brp) @ wh                                      # (65, 64)

    a_row = jnp.concatenate([a, a], axis=1)            # (n, 128)    channels duplicated per packed pair
    a_col = a.reshape(n // 2, LANES)                   # (n//2, 128) two consecutive rows packed in lanes
    zeros = jnp.zeros((NUM_REL, NUM_BINS), jnp.float32)
    s2 = jnp.concatenate(
        [jnp.concatenate([s, zeros], axis=1),
         jnp.concatenate([zeros, s], axis=1)], axis=0).astype(jnp.bfloat16)     # (130, 128)

    # ---- tile selection bounded by VMEM (independent of n) ----
    if ti is None:
        ti = _pick_tile(n, (128, 64, 32, 16, 8))
    if tj is None:
        tj = _pick_tile(n, (64, 32, 16))
    assert n % ti == 0 and n % tj == 0 and tj % 2 == 0
    tjh = tj // 2

    kernel = functools.partial(_pair_logits_kernel, ti=ti, tjh=tjh)
    out = pl.pallas_call(
        kernel,
        out_shape=jax.ShapeDtypeStruct((n, n // 2, LANES), jnp.float32),
        grid_spec=pltpu.PrefetchScalarGridSpec(
            num_scalar_prefetch=0,
            grid=(n // ti, n // tj),
            in_specs=[
                pl.BlockSpec((ti, LANES), lambda i, j: (i, 0)),    # A rows (duplicated channels)
                pl.BlockSpec((tjh, LANES), lambda i, j: (j, 0)),   # A cols (packed pairs)
                pl.BlockSpec((K2, LANES), lambda i, j: (0, 0)),    # blockdiag(S, S)
            ],
            out_specs=pl.BlockSpec((ti, tjh, LANES), lambda i, j: (i, j, 0)),
        ),
        compiler_params=pltpu.CompilerParams(
            dimension_semantics=("parallel", "parallel"),
            vmem_limit_bytes=48 * 1024 * 1024,   # headroom; stays under v7x's 64 MiB VMEM
        ),
    )(a_row, a_col, s2)

    logits = out.reshape(n, n, NUM_BINS)   # free row-major un-packing of the paired j axis
    bin_edges = jnp.linspace(FIRST_BREAK, LAST_BREAK, NUM_BINS - 1, dtype=jnp.float32)
    return dict(logits=logits, bin_edges=bin_edges)


# ---- Pure-JAX reference (for correctness check) -----------------------------
def _reference_forward(seq, params):
    wl, bl, wr, br, wrp, brp, wh, bh = params
    n = seq.shape[0]
    x = jax.nn.one_hot(seq.astype(jnp.int32), N_BASE, dtype=jnp.float32)
    left = x @ wl + bl[0]
    right = x @ wr + br[0]
    pair = left[:, None, :] + right[None, :, :]
    pos = jnp.arange(n)
    off = pos[:, None] - pos[None, :]
    rel_oh = jax.nn.one_hot(jnp.clip(off + MAX_REL, 0, 2 * MAX_REL), NUM_REL,
                            dtype=jnp.float32)
    pair = pair + rel_oh @ wrp + brp[0]
    half = pair @ wh + bh[0]
    logits = half + jnp.swapaxes(half, 0, 1)
    return logits


# ---- Deterministic parameter init -------------------------------------------
def _make_params(key):
    ks = jax.random.split(key, 8)
    wl = 0.1 * jax.random.normal(ks[0], (N_BASE, PAIR_CHANNEL), jnp.float32)
    bl = 0.1 * jax.random.normal(ks[1], (1, PAIR_CHANNEL), jnp.float32)
    wr = 0.1 * jax.random.normal(ks[2], (N_BASE, PAIR_CHANNEL), jnp.float32)
    br = 0.1 * jax.random.normal(ks[3], (1, PAIR_CHANNEL), jnp.float32)
    wrp = 0.1 * jax.random.normal(ks[4], (NUM_REL, PAIR_CHANNEL), jnp.float32)
    brp = 0.1 * jax.random.normal(ks[5], (1, PAIR_CHANNEL), jnp.float32)
    wh = 0.1 * jax.random.normal(ks[6], (PAIR_CHANNEL, NUM_BINS), jnp.float32)
    bh = 0.1 * jax.random.normal(ks[7], (1, NUM_BINS), jnp.float32)
    return (wl, bl, wr, br, wrp, brp, wh, bh)


if __name__ == "__main__":
    key = jax.random.PRNGKey(0)
    n = 32  # small example sequence length (even)
    seq = jax.random.randint(jax.random.fold_in(key, 1), (n,), 0, N_BASE, jnp.int32)
    y_feat = {}  # unused by the forward pass (only needed for .loss)
    params = _make_params(jax.random.fold_in(key, 2))

    # ti=tj=16 -> grid (2, 2): exercises both tiled axes even at this tiny size.
    out = relpos_distohead_forward(seq, y_feat, params, ti=16, tj=16)
    logits = jax.block_until_ready(out["logits"])
    bin_edges = jax.block_until_ready(out["bin_edges"])

    assert logits.shape == (n, n, NUM_BINS) and logits.dtype == jnp.float32
    assert bin_edges.shape == (NUM_BINS - 1,)

    ref = _reference_forward(seq, params)
    if not jnp.allclose(logits, ref, atol=1e-2, rtol=1e-2):
        err = float(jnp.max(jnp.abs(logits - ref)))
        raise AssertionError(f"Pallas kernel output does not match JAX reference (max err {err})")

    print("KERNEL_OK")
</pallas_src>

<mosaic_0001>
module attributes {stable_mosaic.version = 11 : i64} {
  func.func @_pair_logits_kernel(%arg0: i32, %arg1: i32, %arg2: memref<16x128xf32, #tpu.memory_space<vmem>>, %arg3: memref<8x128xf32, #tpu.memory_space<vmem>>, %arg4: memref<130x128xbf16, #tpu.memory_space<vmem>>, %arg5: memref<16x8x128xf32, #tpu.memory_space<vmem>>) attributes {dimension_semantics = [#tpu.dimension_semantics<parallel>, #tpu.dimension_semantics<parallel>], iteration_bounds = array<i64: 2, 2>, scalar_prefetch = 0 : i64, scratch_operands = 0 : i64, tpu.core_type = #tpu.core_type<tc>, window_params = [{transform_indices = @transform_0, window_bounds = array<i64: 16, 128>}, {transform_indices = @transform_1, window_bounds = array<i64: 8, 128>}, {pipeline_mode = #tpu.pipeline_mode<synchronous>, transform_indices = @transform_2, window_bounds = array<i64: 130, 128>}, {transform_indices = @transform_3, window_bounds = array<i64: 16, 8, 128>}]} {
    %c16_i32 = arith.constant 16 : i32
    %0 = arith.muli %arg0, %c16_i32 : i32
    %c16_i32_0 = arith.constant 16 : i32
    %1 = arith.muli %arg1, %c16_i32_0 : i32
    %2 = tpu.iota {dimensions = array<i32: 0>} : vector<16x8xi32>
    %3 = tpu.iota {dimensions = array<i32: 1>} : vector<16x8xi32>
    %4 = arith.subi %0, %1 : i32
    %c32_i32 = arith.constant 32 : i32
    %5 = arith.addi %4, %c32_i32 : i32
    %6 = vector.broadcast %5 : i32 to vector<16x8xi32>
    %7 = arith.addi %6, %2 : vector<16x8xi32>
    %c2_i32 = arith.constant 2 : i32
    %8 = vector.broadcast %c2_i32 : i32 to vector<16x8xi32>
    %9 = arith.muli %8, %3 : vector<16x8xi32>
    %10 = arith.subi %7, %9 : vector<16x8xi32>
    %c0_i32 = arith.constant 0 : i32
    %c64_i32 = arith.constant 64 : i32
    %11 = vector.broadcast %c0_i32 : i32 to vector<16x8xi32>
    %12 = arith.maxsi %11, %10 : vector<16x8xi32>
    %13 = vector.broadcast %c64_i32 : i32 to vector<16x8xi32>
    %14 = arith.minsi %13, %12 : vector<16x8xi32>
    %c1_i32 = arith.constant 1 : i32
    %15 = vector.broadcast %c1_i32 : i32 to vector<16x8xi32>
    %16 = arith.subi %10, %15 : vector<16x8xi32>
    %c0_i32_1 = arith.constant 0 : i32
    %c64_i32_2 = arith.constant 64 : i32
    %17 = vector.broadcast %c0_i32_1 : i32 to vector<16x8xi32>
    %18 = arith.maxsi %17, %16 : vector<16x8xi32>
    %19 = vector.broadcast %c64_i32_2 : i32 to vector<16x8xi32>
    %20 = arith.minsi %19, %18 : vector<16x8xi32>
    %c65_i32 = arith.constant 65 : i32
    %21 = vector.broadcast %c65_i32 : i32 to vector<16x8xi32>
    %22 = arith.addi %20, %21 : vector<16x8xi32>
    %23 = tpu.iota {dimensions = array<i32: 2>} : vector<16x8x130xi32>
    %24 = vector.shape_cast %14 : vector<16x8xi32> to vector<16x8x1xi32>
    %25 = vector.broadcast %24 : vector<16x8x1xi32> to vector<16x8x130xi32>
    %26 = arith.cmpi eq, %25, %23 : vector<16x8x130xi32>
    %27 = arith.extui %26 : vector<16x8x130xi1> to vector<16x8x130xi32>
    %28 = arith.sitofp %27 : vector<16x8x130xi32> to vector<16x8x130xf32>
    %29 = arith.truncf %28 : vector<16x8x130xf32> to vector<16x8x130xbf16>
    %30 = vector.shape_cast %22 : vector<16x8xi32> to vector<16x8x1xi32>
    %31 = vector.broadcast %30 : vector<16x8x1xi32> to vector<16x8x130xi32>
    %32 = arith.cmpi eq, %31, %23 : vector<16x8x130xi32>
    %33 = arith.extui %32 : vector<16x8x130xi1> to vector<16x8x130xi32>
    %34 = arith.sitofp %33 : vector<16x8x130xi32> to vector<16x8x130xf32>
    %35 = arith.truncf %34 : vector<16x8x130xf32> to vector<16x8x130xbf16>
    %36 = arith.addf %29, %35 : vector<16x8x130xbf16>
    %37 = vector.shape_cast %36 : vector<16x8x130xbf16> to vector<128x130xbf16>
    %c0 = arith.constant 0 : index
    %c0_3 = arith.constant 0 : index
    %38 = vector.load %arg4[%c0, %c0_3] : memref<130x128xbf16, #tpu.memory_space<vmem>>, vector<130x128xbf16>
    %cst = arith.constant dense<0.000000e+00> : vector<128x128xf32>
    %39 = tpu.matmul %37, %38, %cst {dimension_numbers = #tpu.dot_dimension_numbers<[1], [0], [0], [1], [0, 0, 1, 1], [], []>} : vector<128x130xbf16>, vector<130x128xbf16>, vector<128x128xf32> -> vector<128x128xf32>
    %40 = vector.shape_cast %39 : vector<128x128xf32> to vector<16x8x128xf32>
    %c0_4 = arith.constant 0 : index
    %c0_5 = arith.constant 0 : index
    %41 = vector.load %arg2[%c0_4, %c0_5] : memref<16x128xf32, #tpu.memory_space<vmem>>, vector<16x128xf32>
    %42 = vector.shape_cast %41 : vector<16x128xf32> to vector<16x1x128xf32>
    %43 = vector.broadcast %42 : vector<16x1x128xf32> to vector<16x8x128xf32>
    %44 = arith.addf %40, %43 : vector<16x8x128xf32>
    %c0_6 = arith.constant 0 : index
    %c0_7 = arith.constant 0 : index
    %45 = vector.load %arg3[%c0_6, %c0_7] : memref<8x128xf32, #tpu.memory_space<vmem>>, vector<8x128xf32>
    %46 = vector.shape_cast %45 : vector<8x128xf32> to vector<1x8x128xf32>
    %47 = vector.broadcast %46 : vector<1x8x128xf32> to vector<16x8x128xf32>
    %48 = arith.addf %44, %47 : vector<16x8x128xf32>
    %c0_8 = arith.constant 0 : index
    %c0_9 = arith.constant 0 : index
    %c0_10 = arith.constant 0 : index
    %49 = vector.load %arg5[%c0_8, %c0_9, %c0_10] : memref<16x8x128xf32, #tpu.memory_space<vmem>>, vector<16x8x128xf32>
    tpu.vector_store %arg5[%c0_8, %c0_9, %c0_10], %48 {strides = array<i32>} : memref<16x8x128xf32, #tpu.memory_space<vmem>>, vector<16x8x128xf32>,
    return
  }
  func.func @transform_0(%arg0: i32, %arg1: i32) -> (i32, i32) {
    %c0_i32 = arith.constant 0 : i32
    %c0_i32_0 = arith.constant 0 : i32
    return %arg0, %c0_i32 : i32, i32
  }
  func.func @transform_1(%arg0: i32, %arg1: i32) -> (i32, i32) {
    %c0_i32 = arith.constant 0 : i32
    %c0_i32_0 = arith.constant 0 : i32
    return %arg1, %c0_i32 : i32, i32
  }
  func.func @transform_2(%arg0: i32, %arg1: i32) -> (i32, i32) {
    %c0_i32 = arith.constant 0 : i32
    %c0_i32_0 = arith.constant 0 : i32
    %c0_i32_1 = arith.constant 0 : i32
    return %c0_i32, %c0_i32_0 : i32, i32
  }
  func.func @transform_3(%arg0: i32, %arg1: i32) -> (i32, i32, i32) {
    %c0_i32 = arith.constant 0 : i32
    %c0_i32_0 = arith.constant 0 : i32
    return %arg0, %arg1, %c0_i32 : i32, i32, i32
  }
}

</mosaic_0001>

<bundles_post_ra>
// kernel: tpu_custom_call.1
= control target key start
LH: loop header
LB: loop body
LE: loop exit
PB: predicated region body
PF: predicated region fallthrough
CT: control target
= control target key end

     0   :  { %s2798_s0 = inlined_call_operand.hbm [shape: f32[32,128], index: 0, kind: input, shape index: {}]   ;;  %s2799_s1 = inlined_call_operand.hbm [shape: f32[16,128], index: 1, kind: input, shape index: {}]   ;;  %s2800_s2 = inlined_call_operand.hbm [shape: bf16[130,128], index: 2, kind: input, shape index: {}]   ;;  %s2801_s3 = inlined_call_operand.hbm [shape: f32[32,16,128], index: 3, kind: output, shape index: {}]  }
   0x1   :  { %2817 = sst [smem:[#allocation20_spill]] %s2798_s0 }
   0x2   :  { %2818 = sst [smem:[#allocation21_spill]] %s2800_s2 }
   0x3   :  { %2819 = sst [smem:[#allocation22_spill]] %s2801_s3 }
   0x4   :  { %8 = vsyncpa [#allocation3], 0 }
   0x5   :  { %10 = vsyncpa [#allocation3 + $0x1], 0 }
   0x6   :  { %11 = vsyncpa [#allocation6], 0 }
   0x7   :  { %13 = vsyncpa [#allocation6 + $0x1], 0 }
   0x8   :  { %14 = vsyncpa [#allocation4], 0 }
   0x9   :  { %16 = vsyncpa [#allocation4 + $0x1], 0  ;;  %s2035_s12 = smov 0   ;;  %s2037_s13 = smov 0  }
   0xa   :  { %s2039_s14 = smov 0   ;;  %s2041_s15 = smov 0  }
   0xb   :  { %s2043_s16 = smov 0   ;;  %s2045_s17 = smov 0  }
   0xc   :  { %s2047_s18 = smov 0   ;;  %s2049_s19 = smov 0  }
   0xd   :  { %s2051_s20 = smov 0   ;;  %s2053_s21 = smov 0  }
   0xe   :  { %s2055_s22 = smov 0   ;;  %s2057_s23 = smov 0  }
   0xf   :  { %s2059_s24 = smov 0   ;;  %s2061_s25 = smov 0  }
  0x10 LB: > { %2820 = sst [smem:[#allocation13_spill]] %s1947_s12  ;;  %s2104_s26 = sadd.s32 4294967295, %s1999_s25   ;;  %s1999_s25 = sphi %s2061_s25, %s22_s25   ;;  %s1995_s24 = sphi %s2059_s24, %s2867_s24   ;;  %s1991_s23 = sphi %s2057_s23, %s2866_s23   ;;  %s1987_s22 = sphi %s2055_s22, %s2865_s22   ;;  %s1983_s21 = sphi %s2053_s21, %s2864_s21   ;;  %s1979_s20 = sphi %s2051_s20, %s2863_s20   ;;  %s1975_s19 = sphi %s2049_s19, %s2862_s19   ;;  %s1971_s18 = sphi %s2047_s18, %s2861_s18   ;;  %s1967_s17 = sphi %s2045_s17, %s2860_s17   ;;  %s1963_s16 = sphi %s2043_s16, %s2859_s16   ;;  %s1959_s15 = sphi %s2041_s15, %s2858_s15   ;;  %s1955_s14 = sphi %s2039_s14, %s2857_s14   ;;  %s1951_s13 = sphi %s2037_s13, %s2856_s13   ;;  %s1947_s12 = sphi %s2035_s12, %s2854_s12  }
  0x11   : > { %2821 = sst [smem:[#allocation14_spill]] %s1951_s13  ;;  %s1453_s27 = sadd.s32 4294967294, %s1999_s25  }
  0x12   : > { %2822 = sst [smem:[#allocation15_spill]] %s1983_s21  ;;  %p54_p0 = scmp.ne.s32.totalorder %s1975_s19, %s1971_s18 }
  0x13   : > { %2823 = sst [smem:[#allocation16_spill]] %s1987_s22  ;;  %p2803_p1 = scmp.eq.s32.totalorder %s2104_s26, 0 }
  0x14   : > { %p126_p2 = scmp.ne.s32.totalorder %s1955_s14, %s1951_s13  ;;  %p127_p3 = scmp.eq.s32.totalorder %s2104_s26, 3 }
  0x15   : > { %p2114_p4 = por %p2803_p1, %p54_p0  ;;  %p132_p5 = scmp.ne.s32.totalorder %s1951_s13, %s1947_s12 }
  0x16   : > { %p2120_p6 = por %p127_p3, %p126_p2  ;;  %p133_p7 = scmp.eq.s32.totalorder %s1453_s27, 3 }
  0x17   : > { %s2824_s28 = scalar_select %p2114_p4, 1, 0 }
  0x18   : > { %s2825_s29 = scalar_select %p2120_p6, 1, 0 }
  0x19   : > { %p1454_p8 = scmp.ge.s32.totalorder %s1999_s25, 1  ;;  %p140_p9 = scmp.lt.s32.totalorder %s1999_s25, 5 }
  0x1a   : > { %2826 = sst [smem:[#allocation17_spill]] %s2825_s29  ;;  %p2126_p10 = por %p133_p7, %p132_p5 }
  0x1b   : > { %p2130_p11 = pnand %p1454_p8, %p140_p9  ;;  %s2001_s5 = smov [#allocation7]  }
  0x1c   : > { %s2827_s30 = scalar_select %p2126_p10, 1, 0 }
  0x1d   : > { %s2829_s4 = scalar_select %p2130_p11, 1, 0 }
  0x1e   : > { %2828 = sst [smem:[#allocation18_spill]] %s2827_s30  ;;  %s152_s6 = sshll.u32 %s2001_s5, 4  ;;  %s153_s6 = int_to_ptr.vmem [resolvable:$true] %s152_s6 }
  0x1f   : > { %p1604_p12 = pneg %p2130_p11  ;;  %s2831_s2 = sld [smem:[#allocation21_spill]] }
  0x21   : > { %p2138_p13 = pnand %p1604_p12, %p2803_p1 }
  0x23   : > { %p1759_p2 = pneg %p2138_p13 }
  0x25   : > { %s1757_s10 = scalar_lea.hbm %s2831_s2, 1088 }
  0x26   : > { %p1758_p0 = scmp.ne.s32.totalorder %s2831_s2, %s1757_s10  ;;  %p1764_p7 = scmp.lt.u32.totalorder %s1757_s10, %s2831_s2 }
  0x28   : > { %p1760_p3 = pnand %p1759_p2, %p1758_p0 }
  0x2a   : > { %p1761_p5 = pneg %p1760_p3 }
  0x2c   : > { %p1766_p8 = pnand %p1764_p7, %p1761_p5 }
  0x2e   : > { %1769 = shalt.err (!%p1766_p8)
}
  0x2f   : > { %s1770_s30 = scalar_lea.vmem %s153_s6, 1088  ;;  %p1778_p10 = scmp.lt.s32.totalorder %s153_s6, %s153_s6 }
  0x30   : > { %p1771_p9 = scmp.ne.s32.totalorder %s153_s6, %s1770_s30  ;;  %p1779_p6 = scmp.lt.s32.totalorder %s1770_s30, %s1770_s30 }
  0x32   : > { %p1773_p12 = pnand %p1771_p9, %p1759_p2  ;;  %p1780_p4 = por %p1779_p6, %p1778_p10 }
  0x34   : > { %p1774_p1 = pneg %p1773_p12 }
  0x36   : > { %p1781_p11 = pnand %p1780_p4, %p1774_p1 }
  0x38   : > { %1784 = shalt.err (!%p1781_p11)
}
  0x39   : > { %s2002_s8 = smov 64   ;;  %s2003_s9 = smov 4  }
  0x3a   : > { %1607 = dma.hbm_to_vmem [thread:$0]  (!%p2138_p13), %s2831_s2, 1088, %s153_s6, [#allocation6], %s2002_s8, %s2002_s8, %s2003_s9  }
  0x3b   : > { %s34_s30 = sadd.s32 1, %s1995_s24  ;;  %s41_s18 = sadd.s32 1, %s1979_s20 }
  0x3c   : > { %p48_p1 = scmp.ne.s32.totalorder %s1979_s20, %s1975_s19  ;;  %p49_p4 = scmp.eq.s32.totalorder %s1999_s25, 0 }
  0x3d   : > { %p2813_p6 = scmp.lt.s32.totalorder %s1999_s25, 4  ;;  %s166_s27 = sand.u32 1, %s1979_s20  }
  0x3e   : > { %p50_p10 = por %p49_p4, %p48_p1  ;;  %s1457_s5 = sshll.u32 %s166_s27, 4 }
  0x3f   : > { %s1574_s12 = sshll.u32 %s1995_s24, 8  ;;  %s2832_s0 = sld [smem:[#allocation20_spill]] }
  0x40   : > { %s170_s6 = scalar_lea.vmem [#allocation2], %s1457_s5  ;;  %p2175_p11 = pnand %p2813_p6, %p50_p10 }
  0x41   : > { %s177_s7 = sshll.u32 %s170_s6, 4  ;;  %s2181_s9 = scalar_lea.sflag [#allocation3], %s166_s27  ;;  %s2179_s7 = int_to_ptr.vmem [resolvable:$true] %s177_s7 }
  0x42   : > { %p1787_p0 = pneg %p2175_p11 }
  0x45   : > { %s2171_s13 = scalar_lea.hbm %s2832_s0, %s1574_s12  ;;  %s1790_s10 = scalar_lea.hbm %s2832_s0, 512 }
  0x46   : > { %s1785_s3 = scalar_lea.hbm %s2171_s13, 256  ;;  %p1791_p5 = scmp.lt.u32.totalorder %s2171_s13, %s2832_s0 }
  0x47   : > { %p1786_p13 = scmp.ne.s32.totalorder %s2171_s13, %s1785_s3  ;;  %p1792_p7 = scmp.lt.u32.totalorder %s1790_s10, %s1785_s3 }
  0x48   : > { %p1794_p9 = scmp.lt.u32.totalorder %s1785_s3, %s2171_s13 }
  0x49   : > { %p1788_p2 = pnand %p1787_p0, %p1786_p13  ;;  %p1793_p8 = por %p1792_p7, %p1791_p5 }
  0x4b   : > { %p1789_p3 = pneg %p1788_p2  ;;  %p1795_p12 = por %p1794_p9, %p1793_p8 }
  0x4d   : > { %p1796_p1 = pnand %p1795_p12, %p1789_p3 }
  0x4f   : > { %1799 = shalt.err (!%p1796_p1)
}
  0x50   : > { %s1800_s27 = scalar_lea.vmem %s2179_s7, 256  ;;  %s2004_s6 = smov [#allocation2]  }
  0x51   : > { %p1801_p10 = scmp.ne.s32.totalorder %s2179_s7, %s1800_s27  ;;  %s1805_s12 = sshll.u32 %s2004_s6, 4  ;;  %s1806_s12 = int_to_ptr.vmem [resolvable:$false] %s1805_s12 }
  0x52   : > { %s1807_s29 = scalar_lea.vmem %s1806_s12, 512  ;;  %p1808_p6 = scmp.lt.s32.totalorder %s2179_s7, %s1806_s12 }
  0x53   : > { %p1803_p13 = pnand %p1801_p10, %p1787_p0  ;;  %p1809_p5 = scmp.lt.s32.totalorder %s1807_s29, %s1800_s27 }
  0x55   : > { %p1804_p2 = pneg %p1803_p13  ;;  %p1810_p7 = por %p1809_p5, %p1808_p6 }
  0x57   : > { %p1811_p8 = pnand %p1810_p7, %p1804_p2 }
  0x59   : > { %1814 = shalt.err (!%p1811_p8)
}
  0x5a   : > { %s2005_s3 = smov 128   ;;  %s2006_s10 = smov 8  }
  0x5b   : > { %1611 = dma.hbm_to_vmem [thread:$0]  (!%p2175_p11), %s2171_s13, 256, %s2179_s7, %s2181_s9, %s2005_s3, %s2005_s3, %s2006_s10  }
  0x5c   : > { %s31_s11 = sadd.s32 1, %s1991_s23  ;;  %s67_s5 = sadd.s32 1, %s1967_s17 }
  0x5d   : > { %p32_p6 = scmp.ge.s32.totalorder %s31_s11, 2  ;;  %p74_p0 = scmp.ne.s32.totalorder %s1967_s17, %s1963_s16 }
  0x5e   : > { %p80_p3 = scmp.ne.s32.totalorder %s1963_s16, %s1959_s15  ;;  %s116_s27 = sadd.s32 1, %s1955_s14 }
  0x5f   : > { %s2869_s11 = smov (%p32_p6, %s31_s11), 0  ;;  %s2871_s30 = smov (!%p32_p6, %s34_s30), %s1995_s24 }
  0x60   : > { %2834 = sst [smem:[#allocation19_spill]] %s2869_s11  ;;  %s64_s6 = ssub.s32 %s1991_s23, %s2869_s11 }
  0x61   : > { %p2225_p11 = por %p74_p0, %p49_p4  ;;  %p36_p9 = scmp.ge.s32.totalorder %s2871_s30, 2 }
  0x62   : > { %p65_p12 = scmp.eq.s32.totalorder %s64_s6, 0  ;;  %p2836_p1 = scmp.eq.s32.totalorder %s2104_s26, 0 }
  0x63   : > { %s187_s7 = sand.u32 1, %s1999_s25   ;;  %s2873_s30 = smov (%p36_p9, %s2871_s30), 0 }
  0x64   : > { %p2231_p10 = por %p80_p3, %p2836_p1  ;;  %s38_s9 = ssub.s32 %s1995_s24, %s2873_s30 }
  0x65   : > { %s2239_s8 = scalar_select %p65_p12, %s1967_s17, %s67_s5  }
  0x66   : > { %p39_p4 = scmp.eq.s32.totalorder %s38_s9, 0  ;;  %s113_s12 = sor.u32 %s64_s6, %s38_s9 }
  0x67   : > { %p114_p13 = scmp.eq.s32.totalorder %s113_s12, 0  ;;  %s189_s29 = sand.u32 1, %s1967_s17  }
  0x68   : > { %s2247_s3 = scalar_select %p39_p4, %s1979_s20, %s41_s18  }
  0x69   : > { %s2250_s10 = scalar_select %p114_p13, %s1955_s14, %s116_s27  }
  0x6a   : > { %s1460_s0 = sshll.u32 %s189_s29, 3  ;;  %s1461_s2 = sshll.u32 %s1991_s23, 7 }
  0x6b   : > { %s2256_s22 = scalar_lea.hbm %s2799_s1, %s1461_s2  ;;  %s191_s5 = scalar_lea.vmem [#allocation5], %s1460_s0 }
  0x6c   : > { %s198_s6 = sshll.u32 %s191_s5, 4  ;;  %p2838_p2 = scmp.lt.s32.totalorder %s1999_s25, 4  ;;  %s2266_s6 = int_to_ptr.vmem [resolvable:$true] %s198_s6 }
  0x6d   : > { %s188_s27 = scalar_lea.sflag [#allocation6], %s187_s7  ;;  %s1815_s21 = scalar_lea.hbm %s2256_s22, 128 }
  0x6e   : > { %p2262_p5 = pnand %p2838_p2, %p2225_p11  ;;  %p1816_p7 = scmp.ne.s32.totalorder %s2256_s22, %s1815_s21 }
  0x6f   : > { %s1820_s11 = scalar_lea.hbm %s2799_s1, 256  ;;  %p1821_p3 = scmp.lt.u32.totalorder %s2256_s22, %s2799_s1 }
  0x70   : > { %p1817_p8 = pneg %p2262_p5  ;;  %p1822_p11 = scmp.lt.u32.totalorder %s1820_s11, %s1815_s21 }
  0x71   : > { %p1824_p12 = scmp.lt.u32.totalorder %s1815_s21, %s2256_s22 }
  0x72   : > { %p1818_p6 = pnand %p1817_p8, %p1816_p7  ;;  %p1823_p9 = por %p1822_p11, %p1821_p3 }
  0x74   : > { %p1819_p0 = pneg %p1818_p6  ;;  %p1825_p1 = por %p1824_p12, %p1823_p9 }
  0x76   : > { %p1826_p4 = pnand %p1825_p1, %p1819_p0 }
  0x78   : > { %1829 = shalt.err (!%p1826_p4)
}
  0x79   : > { %s1830_s7 = scalar_lea.vmem %s2266_s6, 128  ;;  %s2007_s12 = smov [#allocation5]  }
  0x7a   : > { %p1831_p13 = scmp.ne.s32.totalorder %s2266_s6, %s1830_s7  ;;  %s1835_s29 = sshll.u32 %s2007_s12, 4  ;;  %s1836_s29 = int_to_ptr.vmem [resolvable:$false] %s1835_s29 }
  0x7b   : > { %s1837_s5 = scalar_lea.vmem %s1836_s29, 256  ;;  %p1838_p6 = scmp.lt.s32.totalorder %s2266_s6, %s1836_s29 }
  0x7c   : > { %p1833_p2 = pnand %p1831_p13, %p1817_p8  ;;  %p1839_p3 = scmp.lt.s32.totalorder %s1837_s5, %s1830_s7 }
  0x7e   : > { %p1834_p7 = pneg %p1833_p2  ;;  %p1840_p11 = por %p1839_p3, %p1838_p6 }
  0x80   : > { %p1841_p9 = pnand %p1840_p11, %p1834_p7 }
  0x82   : > { %1844 = shalt.err (!%p1841_p9)
}
  0x83   : > { %1614 = dma.hbm_to_vmem [thread:$0]  (!%p2262_p5), %s2256_s22, 128, %s2266_s6, %s188_s27  }
  0x84   : > { %p2840_p0 = scmp.ne.s32.totalorder %s2829_s4, 0 }
  0x85   : > { %s209_s21 = sand.u32 (!%p2840_p0), 1, %s1975_s19   ;;  %p2841_p8 = scmp.ne.s32.totalorder (!%p2840_p0), %s2824_s28, 0 }
  0x86   : > { %207 = sbr.rel (%p2840_p0) target bundleno = 587 (0x24b), region = 32  ;;  %s2296_s0 = sshll.u32 (!%p2840_p0), %s209_s21, 4 }
  0x87   : > { %s210_s2 = scalar_lea.sflag (!%p2840_p0), [#allocation3], %s209_s21  ;;  %s213_s11 = scalar_lea.vmem (!%p2840_p0), [#allocation2], %s2296_s0 }
  0x8d   : > { %1930 = dma.done.wait (%p2841_p8), %s210_s2, 256  }
  0x8e   : > { %1932 = vsyncadd (%p2841_p8), %s210_s2, 4294967040  ;;  %s218_s22 = sand.u32 1, %s2104_s26   ;;  %s220_s6 = sand.u32 1, %s1963_s16  }
  0x8f   : > { %s2305_s4 = sshll.u32 %s220_s6, 3  ;;  %s219_s18 = scalar_lea.sflag [#allocation6], %s218_s22 }
  0x90   : > { %s222_s27 = scalar_lea.vmem [#allocation5], %s2305_s4 }
  0x91   : > { %1934 = dma.done.wait (%p2231_p10), %s219_s18, 128  }
  0x92   : > { %1936 = vsyncadd (%p2231_p10), %s219_s18, 4294967168  ;;  %s2842_s13 = sld [smem:[#allocation16_spill]]  ;;  %s2843_s9 = sld [smem:[#allocation15_spill]]  ;;  %v259_v0 = vlaneseq }
  0x93   : > { %p2844_p5 = scmp.eq.s32.totalorder %s2104_s26, 0 }
  0x98   : > { %s1467_s28 = sshll.u32 %s2842_s13, 4  ;;  %s1468_s7 = sshll.u32 %s2843_s9, 4 }
  0x99   : > { %1938 = dma.done.wait (%p2844_p5), [#allocation6], 1088   ;;  %p2845_p12 = pmov %p2844_p5 }
  0x9a   : > { %s264_s12 = ssub.s32 %s1467_s28, %s1468_s7  ;;  %v2008_v1 = vmov 0   ;;  %v2320_v2 = vshrl.u32 %v259_v0, 7  ;;  %v2322_v3 = vand.u32 127, %v259_v0  ;;  %v1746_v12 = vld [vmem:[#allocation7] sm:$0xff]   ;;  %v1747_v16 = vld [vmem:[#allocation7 + $0x8] sm:$0xff]   ;;  %v1748_v24 = vld [vmem:[#allocation7 + $0x10] sm:$0xff]  }
  0x9b   : > { %1940 = vsyncadd (%p2845_p12), [#allocation6], 4294966208  ;;  %990 = vmatprep.subr.bf16.mxu0 %v2008_v1  ;;  %1576 = vmatprep.subr.bf16.mxu1 %v2008_v1  ;;  %s265_s15 = sadd.s32 32, %s264_s12  ;;  %v1749_v30 = vld [vmem:[#allocation7 + $0x18] sm:$0xff]   ;;  %v1750_v34 = vld [vmem:[#allocation7 + $0x20] sm:$0xff]   ;;  %vm986_vm8 = vcmask 1040384  }
  0x9c   : > { %v266_v4 = vstv %s265_s15  ;;  %v269_v6 = vmul.u32 2, %v2322_v3  ;;  %v261_v7 = vadd.s32 8, %v2320_v2  ;;  %v2328_v9 = vsub.s32 0, %v2320_v2  ;;  %991 = vmatpush1.bf16.msra.mxu0 %v1746_v12  ;;  %1585 = vmatpush1.bf16.msra.mxu1 %v1746_v12  ;;  %v1751_v39 = vld [vmem:[#allocation7 + $0x28] sm:$0xff]   ;;  %v1752_v43 = vld [vmem:[#allocation7 + $0x30] sm:$0xff]   ;;  %v1753_v46 = vld [vmem:[#allocation7 + $0x38] sm:$0xff]  }
  0x9d   : > { %v267_v5 = vadd.s32 %v266_v4, %v2320_v2  ;;  %v2331_v10 = vsub.s32 3, %v2320_v2  ;;  %v2334_v17 = vsub.s32 1, %v2320_v2  ;;  %992 = vmatprep.subr.bf16.mxu0 %v2008_v1  ;;  %1577 = vmatprep.subr.bf16.mxu1 %v2008_v1  ;;  %v2349_v27 = vsub.s32 2, %v2320_v2  ;;  %v1754_v49 = vld [vmem:[#allocation7 + $0x40] ss:$0 sps:$4 sm:$0x11]  }
  0x9e   : > { %v268_v11 = vadd.s32 %v266_v4, %v261_v7  ;;  %v330_v50 = vsub.s32 5, %v2320_v2  ;;  %v323_v53 = vsub.s32 4, %v2320_v2  ;;  %v988_v54 = vsel %vm986_vm8, %v1754_v49, 0  ;;  %s2846_s26 = sld [smem:[#allocation14_spill]]  ;;  %s1575_s0 = sshll.u32 %s2842_s13, 5 }
  0x9f   : > { %v270_v8 = vsub.s32 %v267_v5, %v269_v6  ;;  %v344_v63 = vsub.s32 7, %v2320_v2  ;;  %v337_v0 = vsub.s32 6, %v2320_v2  ;;  %v2416_v12 = vadd.s32 128, %v2322_v3  ;;  %s1331_s2 = sadd.s32 %s2843_s9, %s1575_s0  ;;  %s2847_s22 = sld [smem:[#allocation17_spill]] }
  0xa0   : > { %v271_v15 = vsub.s32 %v268_v11, %v269_v6  ;;  %993 = vmatpush1.bf16.msra.mxu0 %v1747_v16  ;;  %1586 = vmatpush1.bf16.msra.mxu1 %v1747_v16  ;;  %s1571_s6 = sshll.u32 %s1331_s2, 7  ;;  %s2011_s7 = smov [#allocation8]  }
  0xa1   : > { %vm272_vm0 = vcmp.gt.s32.totalorder %v270_v8, 0  ;;  %v1469_v13 = vadd.s32 4294967295, %v270_v8  ;;  %994 = vmatprep.subr.bf16.mxu0 %v2008_v1  ;;  %1578 = vmatprep.subr.bf16.mxu1 %v2008_v1  ;;  %s1849_s12 = sshll.u32 %s2011_s7, 4  ;;  %s1850_s12 = int_to_ptr.vmem [resolvable:$false] %s1849_s12 }
  0xa2   : > { %v273_v14 = vsel %vm272_vm0, %v270_v8, 0  ;;  %vm274_vm3 = vcmp.gt.s32.totalorder %v271_v15, 0  ;;  %v1470_v19 = vadd.s32 4294967295, %v271_v15  ;;  %s1851_s15 = scalar_lea.vmem %s1850_s12, 4096 }
  0xa3   : > { %vm276_vm1 = vcmp.lt.s32.totalorder %v273_v14, 64  ;;  %vm282_vm2 = vcmp.gt.s32.totalorder %v1469_v13, 0  ;;  %v275_v22 = vsel %vm274_vm3, %v271_v15, 0 }
  0xa4   : > { %v2338_v18 = vsel %vm276_vm1, %v273_v14, 64  ;;  %v283_v23 = vsel %vm282_vm2, %v1469_v13, 0  ;;  %vm278_vm4 = vcmp.lt.s32.totalorder %v275_v22, 64  ;;  %vm284_vm5 = vcmp.gt.s32.totalorder %v1470_v19, 0  ;;  %995 = vmatpush1.bf16.msra.mxu0 %v1748_v24  ;;  %1587 = vmatpush1.bf16.msra.mxu1 %v1748_v24  ;;  %s251_s29 = sand.u32 1, %s2846_s26  }
  0xa5   : > { %v317_v20 = vrot.slane %v2338_v18, %v2331_v10  ;;  %v296_v21 = vrot.slane %v2338_v18, %v2328_v9  ;;  %v2344_v25 = vsel %vm278_vm4, %v275_v22, 64  ;;  %v303_v26 = vrot.slane %v2338_v18, %v2334_v17  ;;  %996 = vmatprep.subr.bf16.mxu0 %v2008_v1  ;;  %1579 = vmatprep.subr.bf16.mxu1 %v2008_v1  ;;  %s1466_s5 = sshll.u32 %s251_s29, 7  ;;  %s2722_s9 = scalar_lea.sflag [#allocation4], %s251_s29 }
  0xa6   : > { %v352_v28 = vrot.slane %v2344_v25, %v2328_v9  ;;  %vm286_vm6 = vcmp.lt.s32.totalorder %v283_v23, 64  ;;  %v285_v29 = vsel %vm284_vm5, %v1470_v19, 0  ;;  %v359_v31 = vrot.slane %v2344_v25, %v2334_v17  ;;  %s2657_s21 = scalar_lea.vmem [#allocation8], %s1466_s5  ;;  %p2849_p1 = scmp.ne.s32.totalorder %s2847_s22, 0 }
  0xa7   : > { %319 = vbcast.lane.b32.xlu1 %v317_v20, 256  ;;  %298 = vbcast.lane.b32.xlu0 %v296_v21, 256  ;;  %v310_v32 = vrot.slane %v2338_v18, %v2349_v27  ;;  %v287_v33 = vsel %vm286_vm6, %v283_v23, 64  ;;  %vm288_vm7 = vcmp.lt.s32.totalorder %v285_v29, 64  ;;  %v373_v36 = vrot.slane %v2344_v25, %v2331_v10 }
  0xa8   : > { %997 = vmatpush1.bf16.msra.mxu0 %v1749_v30  ;;  %v2361_v35 = vadd.s32 65, %v287_v33  ;;  %v366_v37 = vrot.slane %v2344_v25, %v2349_v27  ;;  %v289_v38 = vsel %vm288_vm7, %v285_v29, 64  ;;  %1588 = vmatpush1.bf16.msra.mxu1 %v1749_v30  ;;  %v331_v55 = vrot.slane %v2338_v18, %v330_v50 }
  0xa9   : > { %998 = vmatprep.subr.bf16.mxu0 %v2008_v1  ;;  %1580 = vmatprep.subr.bf16.mxu1 %v2008_v1  ;;  %v2369_v40 = vadd.s32 65, %v289_v38  ;;  %v324_v56 = vrot.slane %v2338_v18, %v323_v53  ;;  %v387_v57 = vrot.slane %v2344_v25, %v330_v50  ;;  %v380_v58 = vrot.slane %v2344_v25, %v323_v53 }
  0xaa   : > { %v543_v41 = vrot.slane %v2361_v35, %v2334_v17  ;;  %v536_v42 = vrot.slane %v2361_v35, %v2328_v9  ;;  %v557_v47 = vrot.slane %v2361_v35, %v2331_v10  ;;  %v550_v48 = vrot.slane %v2361_v35, %v2349_v27 }
  0xab   : > { %354 = vbcast.lane.b32.xlu1 %v352_v28, 256  ;;  %305 = vbcast.lane.b32.xlu0 %v303_v26, 256  ;;  %v599_v44 = vrot.slane %v2369_v40, %v2334_v17  ;;  %v592_v45 = vrot.slane %v2369_v40, %v2328_v9  ;;  %v613_v51 = vrot.slane %v2369_v40, %v2331_v10  ;;  %v2009_v17 = vmov 0.0  }
  0xac   : > { %999 = vmatpush1.bf16.msra.mxu0 %v1750_v34  ;;  %1589 = vmatpush1.bf16.msra.mxu1 %v1750_v34  ;;  %v606_v52 = vrot.slane %v2369_v40, %v2349_v27  ;;  %v571_v59 = vrot.slane %v2361_v35, %v330_v50  ;;  %v564_v60 = vrot.slane %v2361_v35, %v323_v53 }
  0xad   : > { %1000 = vmatprep.subr.bf16.mxu0 %v2008_v1  ;;  %1581 = vmatprep.subr.bf16.mxu1 %v2008_v1  ;;  %v627_v61 = vrot.slane %v2369_v40, %v330_v50  ;;  %v620_v62 = vrot.slane %v2369_v40, %v323_v53  ;;  %v338_v4 = vrot.slane %v2338_v18, %v337_v0 }
  0xae   : > { %v401_v5 = vrot.slane %v2344_v25, %v344_v63  ;;  %v394_v6 = vrot.slane %v2344_v25, %v337_v0  ;;  %v585_v7 = vrot.slane %v2361_v35, %v344_v63  ;;  %v578_v8 = vrot.slane %v2361_v35, %v337_v0 }
  0xaf   : > { %361 = vbcast.lane.b32.xlu1 %v359_v31, 256  ;;  %312 = vbcast.lane.b32.xlu0 %v310_v32, 256  ;;  %v641_v10 = vrot.slane %v2369_v40, %v344_v63  ;;  %v634_v11 = vrot.slane %v2369_v40, %v337_v0 }
  0xb0   : > { %1001 = vmatpush1.bf16.msra.mxu0 %v1751_v39  ;;  %1590 = vmatpush1.bf16.msra.mxu1 %v1751_v39 }
  0xb1   : > { %1002 = vmatprep.subr.bf16.mxu0 %v2008_v1  ;;  %1582 = vmatprep.subr.bf16.mxu1 %v2008_v1 }
  0xb3   : > { %375 = vbcast.lane.b32.xlu1 %v373_v36, 256  ;;  %368 = vbcast.lane.b32.xlu0 %v366_v37, 256 }
  0xb4   : > { %1003 = vmatpush1.bf16.msra.mxu0 %v1752_v43  ;;  %1591 = vmatpush1.bf16.msra.mxu1 %v1752_v43 }
  0xb5   : > { %1004 = vmatprep.subr.bf16.mxu0 %v2008_v1  ;;  %1583 = vmatprep.subr.bf16.mxu1 %v2008_v1 }
  0xb7   : > { %545 = vbcast.lane.b32.xlu1 %v543_v41, 256  ;;  %538 = vbcast.lane.b32.xlu0 %v536_v42, 256 }
  0xb8   : > { %1005 = vmatpush1.bf16.msra.mxu0 %v1753_v46  ;;  %1592 = vmatpush1.bf16.msra.mxu1 %v1753_v46 }
  0xb9   : > { %1006 = vmatprep.subr.bf16.mxu0 %v2008_v1  ;;  %1584 = vmatprep.subr.bf16.mxu1 %v2008_v1  ;;  %v345_v1 = vrot.slane %v2338_v18, %v344_v63 }
  0xbb   : > { %601 = vbcast.lane.b32.xlu1 %v599_v44, 256  ;;  %594 = vbcast.lane.b32.xlu0 %v592_v45, 256 }
  0xbc   : > { %1007 = vmatpush1.bf16.msra.mxu0 %v988_v54  ;;  %1593 = vmatpush1.bf16.msra.mxu1 %v988_v54 }
  0xbf   : > { %559 = vbcast.lane.b32.xlu1 %v557_v47, 256  ;;  %552 = vbcast.lane.b32.xlu0 %v550_v48, 256 }
  0xc3   : > { %615 = vbcast.lane.b32.xlu1 %v613_v51, 256  ;;  %608 = vbcast.lane.b32.xlu0 %v606_v52, 256 }
  0xc7   : > { %333 = vbcast.lane.b32.xlu1 %v331_v55, 256  ;;  %326 = vbcast.lane.b32.xlu0 %v324_v56, 256 }
  0xcb   : > { %389 = vbcast.lane.b32.xlu1 %v387_v57, 256  ;;  %382 = vbcast.lane.b32.xlu0 %v380_v58, 256 }
  0xcf   : > { %573 = vbcast.lane.b32.xlu1 %v571_v59, 256  ;;  %566 = vbcast.lane.b32.xlu0 %v564_v60, 256 }
  0xd3   : > { %629 = vbcast.lane.b32.xlu1 %v627_v61, 256  ;;  %622 = vbcast.lane.b32.xlu0 %v620_v62, 256 }
  0xd7   : > { %347 = vbcast.lane.b32.xlu1 %v345_v1, 256  ;;  %340 = vbcast.lane.b32.xlu0 %v338_v4, 256 }
  0xdb   : > { %403 = vbcast.lane.b32.xlu1 %v401_v5, 256  ;;  %396 = vbcast.lane.b32.xlu0 %v394_v6, 256 }
  0xdf   : > { %587 = vbcast.lane.b32.xlu1 %v585_v7, 256  ;;  %580 = vbcast.lane.b32.xlu0 %v578_v8, 256 }
  0xe3   : > { %643 = vbcast.lane.b32.xlu1 %v641_v10, 256  ;;  %636 = vbcast.lane.b32.xlu0 %v634_v11, 256 }
 0x119   : > { %v320_v13 = vpop.permute.xlu1 %319  ;;  %v299_v14 = vpop.permute.xlu0 %298 }
 0x11a   : > { %vm411_vm9 = vcmp.eq.s32.totalorder %v320_v13, %v2322_v3  ;;  %vm412_vm10 = vcmp.eq.s32.totalorder %v320_v13, %v2416_v12  ;;  %vm405_vm11 = vcmp.eq.s32.totalorder %v299_v14, %v2322_v3  ;;  %vm406_vm12 = vcmp.eq.s32.totalorder %v299_v14, %v2416_v12 }
 0x11b   : > { %v2422_v18 = vsel %vm411_vm9, 1.0, %v2009_v17  ;;  %v2425_v19 = vsel %vm412_vm10, 1.0, %v2009_v17  ;;  %v2429_v20 = vsel %vm405_vm11, 1.0, %v2009_v17  ;;  %v2442_v25 = vsel %vm406_vm12, 1.0, %v2009_v17 }
 0x11c   : > { %v507_v23 = vpack.c.bf16 %v2422_v18, %v2422_v18  ;;  %v508_v24 = vpack.c.bf16 %v2425_v19, %v2425_v19  ;;  %v501_v26 = vpack.c.bf16 %v2429_v20, %v2429_v20  ;;  %v502_v35 = vpack.c.bf16 %v2442_v25, %v2442_v25 }
 0x11d   : > { %v355_v15 = vpop.permute.xlu1 %354  ;;  %v306_v16 = vpop.permute.xlu0 %305 }
 0x11e   : > { %vm421_vm13 = vcmp.eq.s32.totalorder %v355_v15, %v2322_v3  ;;  %vm422_vm14 = vcmp.eq.s32.totalorder %v355_v15, %v2416_v12  ;;  %vm407_vm15 = vcmp.eq.s32.totalorder %v306_v16, %v2322_v3  ;;  %vm408_vm0 = vcmp.eq.s32.totalorder %v306_v16, %v2416_v12 }
 0x11f   : > { %v2447_v27 = vsel %vm421_vm13, 1.0, %v2009_v17  ;;  %v2450_v28 = vsel %vm422_vm14, 1.0, %v2009_v17  ;;  %v1473_v29 = vsel %vm407_vm15, 1.0, %v2009_v17  ;;  %v1474_v30 = vsel %vm408_vm0, 1.0, %v2009_v17 }
 0x120   : > { %v517_v36 = vpack.c.bf16 %v2447_v27, %v2447_v27  ;;  %v518_v37 = vpack.c.bf16 %v2450_v28, %v2450_v28  ;;  %v503_v38 = vpack.c.bf16 %v1473_v29, %v1473_v29  ;;  %v504_v39 = vpack.c.bf16 %v1474_v30, %v1474_v30 }
 0x121   : > { %v362_v21 = vpop.permute.xlu1 %361  ;;  %v313_v22 = vpop.permute.xlu0 %312  ;;  %vm961_vm13 = vcmask 15360  }
 0x122   : > { %vm423_vm1 = vcmp.eq.s32.totalorder %v362_v21, %v2322_v3  ;;  %vm424_vm2 = vcmp.eq.s32.totalorder %v362_v21, %v2416_v12  ;;  %vm409_vm3 = vcmp.eq.s32.totalorder %v313_v22, %v2322_v3  ;;  %vm410_vm4 = vcmp.eq.s32.totalorder %v313_v22, %v2416_v12 }
 0x123   : > { %v2455_v31 = vsel %vm423_vm1, 1.0, %v2009_v17  ;;  %v2458_v32 = vsel %vm424_vm2, 1.0, %v2009_v17  ;;  %v2476_v42 = vsel %vm409_vm3, 1.0, %v2009_v17  ;;  %v2479_v43 = vsel %vm410_vm4, 1.0, %v2009_v17 }
 0x124   : > { %v519_v40 = vpack.c.bf16 %v2455_v31, %v2455_v31  ;;  %v520_v41 = vpack.c.bf16 %v2458_v32, %v2458_v32  ;;  %v505_v53 = vpack.c.bf16 %v2476_v42, %v2476_v42  ;;  %v506_v54 = vpack.c.bf16 %v2479_v43, %v2479_v43 }
 0x125   : > { %v376_v33 = vpop.permute.xlu1 %375  ;;  %v369_v34 = vpop.permute.xlu0 %368 }
 0x126   : > { %vm427_vm5 = vcmp.eq.s32.totalorder %v376_v33, %v2322_v3  ;;  %vm428_vm6 = vcmp.eq.s32.totalorder %v376_v33, %v2416_v12  ;;  %vm426_vm7 = vcmp.eq.s32.totalorder %v369_v34, %v2416_v12  ;;  %vm425_vm8 = vcmp.eq.s32.totalorder %v369_v34, %v2322_v3 }
 0x127   : > { %v2482_v44 = vsel %vm427_vm5, 1.0, %v2009_v17  ;;  %v2485_v45 = vsel %vm428_vm6, 1.0, %v2009_v17  ;;  %v2489_v46 = vsel %vm426_vm7, 1.0, %v2009_v17  ;;  %v2504_v55 = vsel %vm425_vm8, 1.0, %v2009_v17 }
 0x128   : > { %v523_v57 = vpack.c.bf16 %v2482_v44, %v2482_v44  ;;  %v524_v63 = vpack.c.bf16 %v2485_v45, %v2485_v45  ;;  %v522_v0 = vpack.c.bf16 %v2489_v46, %v2489_v46  ;;  %v521_v18 = vpack.c.bf16 %v2504_v55, %v2504_v55 }
 0x129   : > { %v546_v47 = vpop.permute.xlu1 %545  ;;  %v539_v48 = vpop.permute.xlu0 %538 }
 0x12a   : > { %vm647_vm9 = vcmp.eq.s32.totalorder %v546_v47, %v2322_v3  ;;  %vm648_vm10 = vcmp.eq.s32.totalorder %v546_v47, %v2416_v12  ;;  %vm645_vm11 = vcmp.eq.s32.totalorder %v539_v48, %v2322_v3  ;;  %vm646_vm12 = vcmp.eq.s32.totalorder %v539_v48, %v2416_v12 }
 0x12b   : > { %v1505_v49 = vsel %vm647_vm9, 1.0, %v2009_v17  ;;  %v1506_v50 = vsel %vm648_vm10, 1.0, %v2009_v17  ;;  %v1503_v51 = vsel %vm645_vm11, 1.0, %v2009_v17  ;;  %v1504_v52 = vsel %vm646_vm12, 1.0, %v2009_v17 }
 0x12c   : > { %v743_v56 = vpack.c.bf16 %v1505_v49, %v1505_v49  ;;  %v744_v58 = vpack.c.bf16 %v1506_v50, %v1506_v50  ;;  %v741_v59 = vpack.c.bf16 %v1503_v51, %v1503_v51  ;;  %v742_v60 = vpack.c.bf16 %v1504_v52, %v1504_v52 }
 0x12d   : > { %v602_v61 = vpop.permute.xlu1 %601  ;;  %v595_v62 = vpop.permute.xlu0 %594 }
 0x12e   : > { %vm663_vm14 = vcmp.eq.s32.totalorder %v602_v61, %v2322_v3  ;;  %vm664_vm15 = vcmp.eq.s32.totalorder %v602_v61, %v2416_v12  ;;  %vm661_vm0 = vcmp.eq.s32.totalorder %v595_v62, %v2322_v3  ;;  %vm662_vm1 = vcmp.eq.s32.totalorder %v595_v62, %v2416_v12 }
 0x12f   : > { %v1521_v1 = vsel %vm663_vm14, 1.0, %v2009_v17  ;;  %v1522_v4 = vsel %vm664_vm15, 1.0, %v2009_v17  ;;  %v775_v5 = vadd.bf16 %v743_v56, %v503_v38  ;;  %v1519_v7 = vsel %vm661_vm0, 1.0, %v2009_v17 }
 0x130   : > { %v759_v6 = vpack.c.bf16 %v1521_v1, %v1521_v1  ;;  %v1520_v8 = vsel %vm662_vm1, 1.0, %v2009_v17  ;;  %v773_v10 = vadd.bf16 %v741_v59, %v501_v26  ;;  %v760_v11 = vpack.c.bf16 %v1522_v4, %v1522_v4 }
 0x131   : > { %v560_v13 = vpop.permute.xlu1 %559  ;;  %v553_v14 = vpop.permute.xlu0 %552  ;;  %v774_v15 = vadd.bf16 %v742_v60, %v502_v35  ;;  %v776_v16 = vadd.bf16 %v744_v58, %v504_v39  ;;  %v757_v20 = vpack.c.bf16 %v1519_v7, %v1519_v7  ;;  %v758_v21 = vpack.c.bf16 %v1520_v8, %v1520_v8 }
 0x132   : > { %vm651_vm2 = vcmp.eq.s32.totalorder %v560_v13, %v2322_v3  ;;  %vm652_vm3 = vcmp.eq.s32.totalorder %v560_v13, %v2416_v12  ;;  %vm649_vm4 = vcmp.eq.s32.totalorder %v553_v14, %v2322_v3  ;;  %vm650_vm5 = vcmp.eq.s32.totalorder %v553_v14, %v2416_v12 }
 0x133   : > { %v1509_v22 = vsel %vm651_vm2, 1.0, %v2009_v17  ;;  %v1510_v25 = vsel %vm652_vm3, 1.0, %v2009_v17  ;;  %v791_v26 = vadd.bf16 %v759_v6, %v519_v40  ;;  %v1507_v30 = vsel %vm649_vm4, 1.0, %v2009_v17 }
 0x134   : > { %v748_v29 = vpack.c.bf16 %v1510_v25, %v1510_v25  ;;  %v1508_v31 = vsel %vm650_vm5, 1.0, %v2009_v17  ;;  %v747_v33 = vpack.c.bf16 %v1509_v22, %v1509_v22  ;;  %v1536_v35 = vcombine.low %v774_v15, %v776_v16 }
 0x135   : > { %v746_v34 = vpack.c.bf16 %v1508_v31, %v1508_v31  ;;  %v1535_v38 = vcombine.low %v773_v10, %v775_v5  ;;  %v616_v39 = vpop.permute.xlu1 %615  ;;  %v609_v43 = vpop.permute.xlu0 %608  ;;  %v745_v47 = vpack.c.bf16 %v1507_v30, %v1507_v30  ;;  %v789_v40 = vadd.bf16 %v757_v20, %v517_v36 }
 0x136   : > { %v780_v45 = vadd.bf16 %v748_v29, %v508_v24  ;;  %vm667_vm6 = vcmp.eq.s32.totalorder %v616_v39, %v2322_v3  ;;  %vm668_vm7 = vcmp.eq.s32.totalorder %v616_v39, %v2416_v12  ;;  %1560 = vmatprep.mubr.msk.bf16.mxu0 %vm961_vm13, %v1536_v35  ;;  %vm665_vm8 = vcmp.eq.s32.totalorder %v609_v43, %v2322_v3 }
 0x137   : > { %v778_v48 = vadd.bf16 %v746_v34, %v506_v54  ;;  %v1525_v49 = vsel %vm667_vm6, 1.0, %v2009_v17  ;;  %v1526_v50 = vsel %vm668_vm7, 1.0, %v2009_v17  ;;  %1023 = vmatmul.mubr.bf16.vlgmr.msra.gmra.mrb[0].mxu0 %v1535_v38  ;;  %vm666_vm9 = vcmp.eq.s32.totalorder %v609_v43, %v2416_v12 }
 0x138   : > { %v763_v51 = vpack.c.bf16 %v1525_v49, %v1525_v49  ;;  %v764_v19 = vpack.c.bf16 %v1526_v50, %v1526_v50  ;;  %v1523_v52 = vsel %vm665_vm8, 1.0, %v2009_v17  ;;  %v1524_v27 = vsel %vm666_vm9, 1.0, %v2009_v17 }
 0x139   : > { %v1538_v24 = vcombine.low %v778_v48, %v780_v45  ;;  %v790_v36 = vadd.bf16 %v758_v21, %v518_v37  ;;  %v334_v54 = vpop.permute.xlu1 %333  ;;  %v327_v56 = vpop.permute.xlu0 %326  ;;  %v779_v58 = vadd.bf16 %v747_v33, %v507_v23  ;;  %v777_v59 = vadd.bf16 %v745_v47, %v505_v53 }
 0x13a   : > { %v796_v60 = vadd.bf16 %v764_v19, %v524_v63  ;;  %v762_v61 = vpack.c.bf16 %v1524_v27, %v1524_v27  ;;  %v761_v62 = vpack.c.bf16 %v1523_v52, %v1523_v52  ;;  %v792_v1 = vadd.bf16 %v760_v11, %v520_v41 }
 0x13b   : > { %vm415_vm10 = vcmp.eq.s32.totalorder %v334_v54, %v2322_v3  ;;  %vm416_vm11 = vcmp.eq.s32.totalorder %v334_v54, %v2416_v12  ;;  %1561 = vmatprep.mubr.msk.bf16.mxu0 %vm961_vm13, %v1538_v24  ;;  %v795_v23 = vadd.bf16 %v763_v51, %v523_v57  ;;  %v1543_v37 = vcombine.low %v789_v40, %v791_v26 }
 0x13c   : > { %v794_v28 = vadd.bf16 %v762_v61, %v522_v0  ;;  %v1544_v32 = vcombine.low %v790_v36, %v792_v1  ;;  %v1481_v41 = vsel %vm415_vm10, 1.0, %v2009_v17  ;;  %v1482_v42 = vsel %vm416_vm11, 1.0, %v2009_v17 }
 0x13d   : > { %vm413_vm12 = vcmp.eq.s32.totalorder %v327_v56, %v2322_v3  ;;  %v390_v53 = vpop.permute.xlu1 %389  ;;  %v383_v63 = vpop.permute.xlu0 %382  ;;  %vm414_vm14 = vcmp.eq.s32.totalorder %v327_v56, %v2416_v12  ;;  %v1537_v55 = vcombine.low %v777_v59, %v779_v58  ;;  %v793_v57 = vadd.bf16 %v761_v62, %v521_v18 }
 0x13e   : > { %v1546_v4 = vcombine.low %v794_v28, %v796_v60  ;;  %v1479_v44 = vsel %vm413_vm12, 1.0, %v2009_v17  ;;  %1564 = vmatprep.mubr.msk.bf16.mxu1 %vm961_vm13, %v1544_v32  ;;  %v1480_v46 = vsel %vm414_vm14, 1.0, %v2009_v17  ;;  %vm431_vm15 = vcmp.eq.s32.totalorder %v390_v53, %v2322_v3 }
 0x13f   : > { %vm432_vm0 = vcmp.eq.s32.totalorder %v390_v53, %v2416_v12  ;;  %1055 = vmatmul.mubr.bf16.vlgmr.msra.gmra.mrb[0].mxu1 %v1543_v37  ;;  %v511_v0 = vpack.c.bf16 %v1481_v41, %v1481_v41  ;;  %1031 = vmatmul.mubr.bf16.gmra.mrb[4].mxu0 %v1537_v55  ;;  %v1497_v5 = vsel %vm431_vm15, 1.0, %v2009_v17  ;;  %vm429_vm1 = vcmp.eq.s32.totalorder %v383_v63, %v2322_v3 }
 0x140   : > { %v1498_v6 = vsel %vm432_vm0, 1.0, %v2009_v17  ;;  %v512_v7 = vpack.c.bf16 %v1482_v42, %v1482_v42  ;;  %v509_v8 = vpack.c.bf16 %v1479_v44, %v1479_v44  ;;  %v510_v10 = vpack.c.bf16 %v1480_v46, %v1480_v46  ;;  %1565 = vmatprep.mubr.msk.bf16.mxu1 %vm961_vm13, %v1546_v4 }
 0x141   : > { %v527_v11 = vpack.c.bf16 %v1497_v5, %v1497_v5  ;;  %v574_v13 = vpop.permute.xlu1 %573  ;;  %v567_v14 = vpop.permute.xlu0 %566  ;;  %v528_v15 = vpack.c.bf16 %v1498_v6, %v1498_v6  ;;  %vm430_vm2 = vcmp.eq.s32.totalorder %v383_v63, %v2416_v12  ;;  %v1495_v16 = vsel %vm429_vm1, 1.0, %v2009_v17 }
 0x142   : > { %vm655_vm3 = vcmp.eq.s32.totalorder %v574_v13, %v2322_v3  ;;  %v1545_v20 = vcombine.low %v793_v57, %v795_v23  ;;  %vm656_vm4 = vcmp.eq.s32.totalorder %v574_v13, %v2416_v12  ;;  %vm653_vm5 = vcmp.eq.s32.totalorder %v567_v14, %v2322_v3 }
 0x143   : > { %v1513_v21 = vsel %vm655_vm3, 1.0, %v2009_v17  ;;  %v1514_v22 = vsel %vm656_vm4, 1.0, %v2009_v17  ;;  %vm654_vm6 = vcmp.eq.s32.totalorder %v567_v14, %v2416_v12  ;;  %v1511_v26 = vsel %vm653_vm5, 1.0, %v2009_v17 }
 0x144   : > { %v751_v25 = vpack.c.bf16 %v1513_v21, %v1513_v21  ;;  %v1496_v29 = vsel %vm430_vm2, 1.0, %v2009_v17  ;;  %v752_v30 = vpack.c.bf16 %v1514_v22, %v1514_v22  ;;  %v1512_v31 = vsel %vm654_vm6, 1.0, %v2009_v17 }
 0x145   : > { %v749_v33 = vpack.c.bf16 %v1511_v26, %v1511_v26  ;;  %v630_v34 = vpop.permute.xlu1 %629  ;;  %v623_v35 = vpop.permute.xlu0 %622  ;;  %v750_v39 = vpack.c.bf16 %v1512_v31, %v1512_v31  ;;  %v525_v48 = vpack.c.bf16 %v1495_v16, %v1495_v16  ;;  %v526_v36 = vpack.c.bf16 %v1496_v29, %v1496_v29 }
 0x146   : > { %v783_v38 = vadd.bf16 %v751_v25, %v511_v0  ;;  %vm671_vm7 = vcmp.eq.s32.totalorder %v630_v34, %v2322_v3  ;;  %vm672_vm8 = vcmp.eq.s32.totalorder %v630_v34, %v2416_v12  ;;  %v784_v43 = vadd.bf16 %v752_v30, %v512_v7 }
 0x147   : > { %v781_v45 = vadd.bf16 %v749_v33, %v509_v8  ;;  %v1529_v47 = vsel %vm671_vm7, 1.0, %v2009_v17  ;;  %v1530_v40 = vsel %vm672_vm8, 1.0, %v2009_v17  ;;  %1063 = vmatmul.mubr.bf16.gmra.mrb[4].mxu1 %v1545_v20  ;;  %v782_v49 = vadd.bf16 %v750_v39, %v510_v10 }
 0x148   : > { %v768_v50 = vpack.c.bf16 %v1530_v40, %v1530_v40  ;;  %vm669_vm9 = vcmp.eq.s32.totalorder %v623_v35, %v2322_v3  ;;  %v767_v51 = vpack.c.bf16 %v1529_v47, %v1529_v47  ;;  %vm670_vm10 = vcmp.eq.s32.totalorder %v623_v35, %v2416_v12 }
 0x149   : > { %v1527_v19 = vsel %vm669_vm9, 1.0, %v2009_v17  ;;  %v348_v24 = vpop.permute.xlu1 %347  ;;  %v341_v52 = vpop.permute.xlu0 %340  ;;  %v1539_v27 = vcombine.low %v781_v45, %v783_v38  ;;  %v1540_v54 = vcombine.low %v782_v49, %v784_v43  ;;  %v1528_v58 = vsel %vm670_vm10, 1.0, %v2009_v17 }
 0x14a   : > { %v800_v56 = vadd.bf16 %v768_v50, %v528_v15  ;;  %v765_v59 = vpack.c.bf16 %v1527_v19, %v1527_v19  ;;  %v766_v60 = vpack.c.bf16 %v1528_v58, %v1528_v58  ;;  %vm419_vm11 = vcmp.eq.s32.totalorder %v348_v24, %v2322_v3  ;;  %v1087_v58 = vld [vmem:[%s213_s11] sm:$0xff] }
 0x14b   : > { %vm420_vm12 = vcmp.eq.s32.totalorder %v348_v24, %v2416_v12  ;;  %v1485_v61 = vsel %vm419_vm11, 1.0, %v2009_v17  ;;  %vm417_vm14 = vcmp.eq.s32.totalorder %v341_v52, %v2322_v3  ;;  %vm418_vm15 = vcmp.eq.s32.totalorder %v341_v52, %v2416_v12  ;;  %1562 = vmatprep.mubr.msk.bf16.mxu0 %vm961_vm13, %v1540_v54 }
 0x14c   : > { %v1486_v62 = vsel %vm420_vm12, 1.0, %v2009_v17  ;;  %v799_v1 = vadd.bf16 %v767_v51, %v527_v11  ;;  %v797_v18 = vadd.bf16 %v765_v59, %v525_v48  ;;  %v798_v23 = vadd.bf16 %v766_v60, %v526_v36  ;;  %1039 = vmatmul.mubr.bf16.gmra.mrb[8].mxu0 %v1539_v27 }
 0x14d   : > { %v404_v28 = vpop.permute.xlu1 %403  ;;  %v397_v37 = vpop.permute.xlu0 %396  ;;  %v1483_v32 = vsel %vm417_vm14, 1.0, %v2009_v17  ;;  %v1484_v41 = vsel %vm418_vm15, 1.0, %v2009_v17  ;;  %v515_v53 = vpack.c.bf16 %v1485_v61, %v1485_v61  ;;  %v516_v63 = vpack.c.bf16 %v1486_v62, %v1486_v62  ;;  %v1088_v61 = vld [vmem:[%s213_s11 + $0x8] sm:$0xff]  ;;  %s1334_s11 = sshll.u32 %s2657_s21, 4  ;;  %s2710_s11 = int_to_ptr.vmem [resolvable:$true] %s1334_s11 }
 0x14e   : > { %vm435_vm0 = vcmp.eq.s32.totalorder %v404_v28, %v2322_v3  ;;  %vm436_vm1 = vcmp.eq.s32.totalorder %v404_v28, %v2416_v12  ;;  %v1548_v42 = vcombine.low %v798_v23, %v800_v56  ;;  %v513_v44 = vpack.c.bf16 %v1483_v32, %v1483_v32  ;;  %v2652_v32 = vld [vmem:[%s222_s27] sm:$0xff]  ;;  %s2848_s27 = sld [smem:[#allocation22_spill]]  ;;  %s1845_s28 = scalar_lea.vmem %s2710_s11, 2048 }
 0x14f   : > { %v1501_v4 = vsel %vm435_vm0, 1.0, %v2009_v17  ;;  %v1502_v55 = vsel %vm436_vm1, 1.0, %v2009_v17  ;;  %vm433_vm2 = vcmp.eq.s32.totalorder %v397_v37, %v2322_v3  ;;  %vm434_vm3 = vcmp.eq.s32.totalorder %v397_v37, %v2416_v12  ;;  %p1846_p10 = scmp.ne.s32.totalorder %s2710_s11, %s1845_s28  ;;  %p1852_p2 = scmp.lt.s32.totalorder %s2710_s11, %s1850_s12 }
 0x150   : > { %v514_v57 = vpack.c.bf16 %v1484_v41, %v1484_v41  ;;  %v531_v46 = vpack.c.bf16 %v1501_v4, %v1501_v4  ;;  %v532_v0 = vpack.c.bf16 %v1502_v55, %v1502_v55  ;;  %1566 = vmatprep.mubr.msk.bf16.mxu1 %vm961_vm13, %v1548_v42  ;;  %v1547_v5 = vcombine.low %v797_v18, %v799_v1  ;;  %p1853_p7 = scmp.lt.s32.totalorder %s1851_s15, %s1845_s28 }
 0x151   : > { %v588_v6 = vpop.permute.xlu1 %587  ;;  %v581_v7 = vpop.permute.xlu0 %580  ;;  %v1499_v8 = vsel %vm433_vm2, 1.0, %v2009_v17  ;;  %v1500_v10 = vsel %vm434_vm3, 1.0, %v2009_v17  ;;  %p1847_p4 = pnand %p1846_p10, %p2849_p1 }
 0x152   : > { %vm659_vm4 = vcmp.eq.s32.totalorder %v588_v6, %v2322_v3  ;;  %vm660_vm5 = vcmp.eq.s32.totalorder %v588_v6, %v2416_v12  ;;  %1071 = vmatmul.mubr.bf16.gmra.mrb[8].mxu1 %v1547_v5  ;;  %vm657_vm6 = vcmp.eq.s32.totalorder %v581_v7, %v2322_v3  ;;  %vm658_vm7 = vcmp.eq.s32.totalorder %v581_v7, %v2416_v12  ;;  %p1854_p6 = por %p1853_p7, %p1852_p2 }
 0x153   : > { %v1517_v11 = vsel %vm659_vm4, 1.0, %v2009_v17  ;;  %v1518_v13 = vsel %vm660_vm5, 1.0, %v2009_v17  ;;  %v1515_v16 = vsel %vm657_vm6, 1.0, %v2009_v17  ;;  %v1516_v20 = vsel %vm658_vm7, 1.0, %v2009_v17  ;;  %p1848_p13 = pneg %p1847_p4 }
 0x154   : > { %v755_v14 = vpack.c.bf16 %v1517_v11, %v1517_v11  ;;  %v756_v15 = vpack.c.bf16 %v1518_v13, %v1518_v13  ;;  %v529_v21 = vpack.c.bf16 %v1499_v8, %v1499_v8  ;;  %v530_v22 = vpack.c.bf16 %v1500_v10, %v1500_v10  ;;  %s2715_s13 = scalar_lea.hbm %s2848_s27, %s1571_s6 }
 0x155   : > { %v753_v25 = vpack.c.bf16 %v1515_v16, %v1515_v16  ;;  %v754_v26 = vpack.c.bf16 %v1516_v20, %v1516_v20  ;;  %v644_v29 = vpop.permute.xlu1 %643  ;;  %v637_v30 = vpop.permute.xlu0 %636  ;;  %v1091_v5 = vcombine.high %v1087_v58, %v1087_v58  ;;  %p1855_p3 = pnand %p1854_p6, %p1848_p13 }
 0x156   : > { %v787_v31 = vadd.bf16 %v755_v14, %v515_v53  ;;  %v788_v33 = vadd.bf16 %v756_v15, %v516_v63  ;;  %vm675_vm8 = vcmp.eq.s32.totalorder %v644_v29, %v2322_v3  ;;  %vm676_vm9 = vcmp.eq.s32.totalorder %v644_v29, %v2416_v12 }
 0x157   : > { %v785_v34 = vadd.bf16 %v753_v25, %v513_v44  ;;  %v786_v35 = vadd.bf16 %v754_v26, %v514_v57  ;;  %v1533_v38 = vsel %vm675_vm8, 1.0, %v2009_v17  ;;  %v1534_v39 = vsel %vm676_vm9, 1.0, %v2009_v17 }
 0x158   : > { %v771_v43 = vpack.c.bf16 %v1533_v38, %v1533_v38  ;;  %v772_v45 = vpack.c.bf16 %v1534_v39, %v1534_v39  ;;  %vm673_vm10 = vcmp.eq.s32.totalorder %v637_v30, %v2322_v3  ;;  %vm674_vm11 = vcmp.eq.s32.totalorder %v637_v30, %v2416_v12 }
 0x159   : > { %v1542_v47 = vcombine.low %v786_v35, %v788_v33  ;;  %v1531_v40 = vsel %vm673_vm10, 1.0, %v2009_v17  ;;  %v1532_v48 = vsel %vm674_vm11, 1.0, %v2009_v17  ;;  %v1541_v49 = vcombine.low %v785_v34, %v787_v31 }
 0x15a   : > { %v803_v50 = vadd.bf16 %v771_v43, %v531_v46  ;;  %v804_v51 = vadd.bf16 %v772_v45, %v532_v0  ;;  %v769_v19 = vpack.c.bf16 %v1531_v40, %v1531_v40  ;;  %v770_v24 = vpack.c.bf16 %v1532_v48, %v1532_v48 }
 0x15b   : > { %1563 = vmatprep.mubr.msk.bf16.mxu0 %vm961_vm13, %v1542_v47  ;;  %v2010_v17 = vmov 1966171168   ;;  %v1140_v31 = vcombine.high %v1088_v61, %v1088_v61 }
 0x15c   : > { %v801_v52 = vadd.bf16 %v769_v19, %v529_v21  ;;  %v802_v27 = vadd.bf16 %v770_v24, %v530_v22  ;;  %1047 = vmatmul.mubr.bf16.gmra.mrb[12].mxu0 %v1541_v49  ;;  %v1093_v36 = vunpack.c.l.s4 %v2010_v17 }
 0x15e   : > { %v1550_v3 = vcombine.low %v802_v27, %v804_v51  ;;  %v1549_v12 = vcombine.low %v801_v52, %v803_v50  ;;  %v1094_v54 = vunpack.c.0.s8 %v1093_v36 }
 0x160   : > { %1567 = vmatprep.mubr.msk.bf16.mxu1 %vm961_vm13, %v1550_v3  ;;  %v2635_v56 = vsub.s32 %v1094_v54, %v2320_v2 }
 0x161   : > { %1079 = vmatmul.mubr.bf16.gmra.mrb[12].mxu1 %v1549_v12 }
 0x162   : > { %v1098_v59 = vrot.slane %v1087_v58, %v2635_v56  ;;  %v1147_v18 = vrot.slane %v1088_v61, %v2635_v56  ;;  %v1105_v15 = vrot.slane %v1091_v5, %v2635_v56  ;;  %v1154_v50 = vrot.slane %v1140_v31, %v2635_v56 }
 0x164   : > { %v1106_v60 = vcombine.high %v1098_v59, %v1098_v59  ;;  %v1114_v62 = vrot.slane %v1098_v59, %v2635_v56  ;;  %v1155_v28 = vcombine.high %v1147_v18, %v1147_v18  ;;  %v1163_v53 = vrot.slane %v1147_v18, %v2635_v56 }
 0x165   : > { %v1107_v45 = vcombine.high %v1105_v15, %v1105_v15  ;;  %v1121_v49 = vrot.slane %v1105_v15, %v2635_v56  ;;  %v1156_v17 = vcombine.high %v1154_v50, %v1154_v50 }
 0x166   : > { %v1128_v1 = vrot.slane %v1106_v60, %v2635_v56  ;;  %v1192_v23 = vrot.slane %v1114_v62, %v2328_v9  ;;  %v1136_v63 = vcombine.high %v1114_v62, %v1114_v62  ;;  %v1177_v46 = vrot.slane %v1155_v28, %v2635_v56 }
 0x167   : > { %v1224_v7 = vrot.slane %v1163_v53, %v2328_v9  ;;  %v1185_v25 = vcombine.high %v1163_v53, %v1163_v53  ;;  %v1135_v24 = vrot.slane %v1107_v45, %v2635_v56  ;;  %v1208_v12 = vrot.slane %v1121_v49, %v2328_v9 }
 0x168   : > { %v1196_v2 = vrot.slane %v1128_v1, %v2328_v9  ;;  %v1138_v0 = vcombine.high %v1128_v1, %v1128_v1  ;;  %v1200_v8 = vrot.slane %v1136_v63, %v2328_v9  ;;  %v1228_v10 = vrot.slane %v1177_v46, %v2328_v9 }
 0x169   : > { %v1187_v30 = vcombine.high %v1177_v46, %v1177_v46  ;;  %v1232_v48 = vrot.slane %v1185_v25, %v2328_v9  ;;  %v1212_v59 = vrot.slane %v1135_v24, %v2328_v9  ;;  %v1170_v60 = vrot.slane %v1154_v50, %v2635_v56 }
 0x16a   : > { %v1204_v11 = vrot.slane %v1138_v0, %v2328_v9 }
 0x16b   : > { %v1236_v51 = vrot.slane %v1187_v30, %v2328_v9 }
 0x20a   : > { %v1024_v37 = vpop.f32.mrb[0].mxu0 }
 0x20b   : > { %v1269_v41 = vadd.f32 %v1192_v23, %v1024_v37  ;;  %v1026_v42 = vpop.f32.mrb[1].mxu0  ;;  %v1184_v23 = vrot.slane %v1156_v17, %v2635_v56 }
 0x20c   : > { %v1027_v4 = vpop.f32.mrb[2].mxu0  ;;  %v1240_v42 = vrot.slane %v1170_v60, %v2328_v9 }
 0x20d   : > { %v1286_v44 = vadd.f32 %v2652_v32, %v1269_v41  ;;  %v1270_v55 = vadd.f32 %v1196_v2, %v1027_v4  ;;  %v1029_v57 = vpop.f32.mrb[3].mxu0  ;;  %v1244_v63 = vrot.slane %v1184_v23, %v2328_v9 }
 0x20e   : > { %v1137_v57 = vcombine.high %v1121_v49, %v1121_v49 }
 0x20f   : > { %1302 = vst [vmem:[%s2657_s21] sm:$0xff] %v1286_v44  ;;  %v1287_v6 = vadd.f32 %v2652_v32, %v1270_v55 }
 0x211   : > { %1303 = vst [vmem:[%s2657_s21 + $0x8] sm:$0xff] %v1287_v6  ;;  %v1139_v6 = vcombine.high %v1135_v24, %v1135_v24 }
 0x212   : > { %v1056_v13 = vpop.f32.mrb[0].mxu1  ;;  %v1032_v14 = vpop.f32.mrb[4].mxu0 }
 0x213   : > { %v1277_v16 = vadd.f32 %v1224_v7, %v1056_v13  ;;  %v1058_v20 = vpop.f32.mrb[1].mxu1  ;;  %v1271_v21 = vadd.f32 %v1200_v8, %v1032_v14  ;;  %v1034_v22 = vpop.f32.mrb[5].mxu0  ;;  %v1216_v8 = vrot.slane %v1137_v57, %v2328_v9  ;;  %v1188_v14 = vcombine.high %v1184_v23, %v1184_v23 }
 0x214   : > { %v1059_v26 = vpop.f32.mrb[2].mxu1  ;;  %v1035_v29 = vpop.f32.mrb[6].mxu0 }
 0x215   : > { %v1294_v33 = vadd.f32 %v2652_v32, %v1277_v16  ;;  %v1278_v34 = vadd.f32 %v1228_v10, %v1059_v26  ;;  %v1061_v35 = vpop.f32.mrb[3].mxu1  ;;  %v1288_v38 = vadd.f32 %v2652_v32, %v1271_v21  ;;  %v1272_v39 = vadd.f32 %v1204_v11, %v1035_v29  ;;  %v1037_v43 = vpop.f32.mrb[7].mxu0 }
 0x216   : > { %v1186_v10 = vcombine.high %v1170_v60, %v1170_v60  ;;  %v1220_v11 = vrot.slane %v1139_v6, %v2328_v9  ;;  %v1252_v29 = vrot.slane %v1188_v14, %v2328_v9 }
 0x217   : > { %1310 = vst [vmem:[%s2657_s21 + $0x40] sm:$0xff] %v1294_v33  ;;  %v1295_v47 = vadd.f32 %v2652_v32, %v1278_v34  ;;  %1304 = vst [vmem:[%s2657_s21 + $0x10] sm:$0xff] %v1288_v38  ;;  %v1289_v40 = vadd.f32 %v2652_v32, %v1272_v39 }
 0x218   : > { %v1248_v21 = vrot.slane %v1186_v10, %v2328_v9 }
 0x219   : > { %1311 = vst [vmem:[%s2657_s21 + $0x48] sm:$0xff] %v1295_v47  ;;  %1305 = vst [vmem:[%s2657_s21 + $0x18] sm:$0xff] %v1289_v40 }
 0x21a   : > { %v1064_v19 = vpop.f32.mrb[4].mxu1 }
 0x21b   : > { %v1279_v52 = vadd.f32 %v1232_v48, %v1064_v19  ;;  %v1066_v27 = vpop.f32.mrb[5].mxu1 }
 0x21c   : > { %v1067_v3 = vpop.f32.mrb[6].mxu1 }
 0x21d   : > { %v1296_v36 = vadd.f32 %v2652_v32, %v1279_v52  ;;  %v1280_v54 = vadd.f32 %v1236_v51, %v1067_v3  ;;  %v1069_v58 = vpop.f32.mrb[7].mxu1 }
 0x21f   : > { %1312 = vst [vmem:[%s2657_s21 + $0x50] sm:$0xff] %v1296_v36  ;;  %v1297_v61 = vadd.f32 %v2652_v32, %v1280_v54  ;;  %v1040_v62 = vpop.f32.mrb[8].mxu0 }
 0x220   : > { %v1273_v1 = vadd.f32 %v1208_v12, %v1040_v62  ;;  %v1042_v18 = vpop.f32.mrb[9].mxu0 }
 0x221   : > { %1313 = vst [vmem:[%s2657_s21 + $0x58] sm:$0xff] %v1297_v61  ;;  %v1043_v2 = vpop.f32.mrb[10].mxu0 }
 0x222   : > { %v1290_v28 = vadd.f32 %v2652_v32, %v1273_v1  ;;  %v1274_v37 = vadd.f32 %v1212_v59, %v1043_v2  ;;  %v1045_v41 = vpop.f32.mrb[11].mxu0 }
 0x224   : > { %1306 = vst [vmem:[%s2657_s21 + $0x20] sm:$0xff] %v1290_v28  ;;  %v1291_v53 = vadd.f32 %v2652_v32, %v1274_v37 }
 0x225   : > { %v1072_v4 = vpop.f32.mrb[8].mxu1 }
 0x226   : > { %1307 = vst [vmem:[%s2657_s21 + $0x28] sm:$0xff] %v1291_v53  ;;  %v1281_v44 = vadd.f32 %v1240_v42, %v1072_v4  ;;  %v1074_v56 = vpop.f32.mrb[9].mxu1 }
 0x227   : > { %v1075_v55 = vpop.f32.mrb[10].mxu1 }
 0x228   : > { %v1298_v46 = vadd.f32 %v2652_v32, %v1281_v44  ;;  %v1282_v0 = vadd.f32 %v1244_v63, %v1075_v55  ;;  %v1077_v5 = vpop.f32.mrb[11].mxu1 }
 0x22a   : > { %1314 = vst [vmem:[%s2657_s21 + $0x60] sm:$0xff] %v1298_v46  ;;  %v1299_v7 = vadd.f32 %v2652_v32, %v1282_v0 }
 0x22c   : > { %1315 = vst [vmem:[%s2657_s21 + $0x68] sm:$0xff] %v1299_v7 }
 0x22f   : > { %v1048_v13 = vpop.f32.mrb[12].mxu0 }
 0x230   : > { %v1275_v15 = vadd.f32 %v1216_v8, %v1048_v13  ;;  %v1050_v16 = vpop.f32.mrb[13].mxu0 }
 0x231   : > { %v1051_v20 = vpop.f32.mrb[14].mxu0 }
 0x232   : > { %v1292_v22 = vadd.f32 %v2652_v32, %v1275_v15  ;;  %v1276_v25 = vadd.f32 %v1220_v11, %v1051_v20  ;;  %v1053_v26 = vpop.f32.mrb[15].mxu0 }
 0x234   : > { %1308 = vst [vmem:[%s2657_s21 + $0x30] sm:$0xff] %v1292_v22  ;;  %v1293_v30 = vadd.f32 %v2652_v32, %v1276_v25  ;;  %v1080_v31 = vpop.f32.mrb[12].mxu1 }
 0x235   : > { %v1283_v33 = vadd.f32 %v1248_v21, %v1080_v31  ;;  %v1082_v34 = vpop.f32.mrb[13].mxu1 }
 0x236   : > { %1309 = vst [vmem:[%s2657_s21 + $0x38] sm:$0xff] %v1293_v30  ;;  %v1083_v35 = vpop.f32.mrb[14].mxu1 }
 0x237   : > { %v1300_v38 = vadd.f32 %v2652_v32, %v1283_v33  ;;  %v1284_v39 = vadd.f32 %v1252_v29, %v1083_v35  ;;  %v1085_v43 = vpop.f32.mrb[15].mxu1 }
 0x239   : > { %1316 = vst [vmem:[%s2657_s21 + $0x70] sm:$0xff] %v1300_v38  ;;  %v1301_v9 = vadd.f32 %v2652_v32, %v1284_v39 }
 0x23b   : > { %1317 = vst [vmem:[%s2657_s21 + $0x78] sm:$0xff] %v1301_v9 }
 0x23c   : > { %1858 = shalt.err (!%p1855_p3)
}
 0x23d   : > { %s1859_s26 = scalar_lea.hbm %s2715_s13, 2048  ;;  %s1863_s21 = scalar_lea.hbm %s2848_s27, 8192 }
 0x23e   : > { %p1860_p11 = scmp.ne.s32.totalorder %s2715_s13, %s1859_s26  ;;  %p1864_p8 = scmp.lt.u32.totalorder %s2715_s13, %s2848_s27 }
 0x23f   : > { %p1865_p5 = scmp.lt.u32.totalorder %s1863_s21, %s1859_s26  ;;  %p1867_p10 = scmp.lt.u32.totalorder %s1859_s26, %s2715_s13 }
 0x240   : > { %p1861_p9 = pnand %p1860_p11, %p2849_p1 }
 0x241   : > { %p1866_p12 = por %p1865_p5, %p1864_p8 }
 0x242   : > { %p1862_p0 = pneg %p1861_p9 }
 0x243   : > { %p1868_p4 = por %p1867_p10, %p1866_p12 }
 0x245   : > { %p1869_p13 = pnand %p1868_p4, %p1862_p0 }
 0x247   : > { %1872 = shalt.err (!%p1869_p13)
}
 0x248   : > { %s2012_s6 = smov 128   ;;  %s2013_s4 = smov 256  }
 0x249   : > { %s2014_s18 = smov 8  }
 0x24a   : > { %1602 = dma.vmem_to_hbm [thread:$0]  (%p2849_p1), %s2710_s11, 2048, %s2715_s13, %s2722_s9, %s2012_s6, %s2013_s4, %s2014_s18  }
 0x24b PF: > { %s2850_s28 = sld [smem:[#allocation13_spill]]  ;;  %s2851_s7 = sld [smem:[#allocation18_spill]] }
 0x24c   : > { %p1622_p2 = scmp.ge.s32.totalorder %s1999_s25, 2 }
 0x251   : > { %s1349_s12 = sand.u32 1, %s2850_s28   ;;  %p2852_p7 = scmp.ne.s32.totalorder %s2851_s7, 0 }
 0x252   : > { %s1350_s15 = scalar_lea.sflag [#allocation4], %s1349_s12 }
 0x253   : > { %p1616_p6 = pnand %p1622_p2, %p2852_p7 }
 0x255   : > { %1942 = dma.done.wait (!%p1616_p6), %s1350_s15, 2048  }
 0x256   : > { %1944 = vsyncadd (!%p1616_p6), %s1350_s15, 4294965248  ;;  %s22_s25 = sadd.s32 1, %s1999_s25   ;;  %s2854_s12 = sld [smem:[#allocation14_spill]] }
 0x257   : > { %p2751_p3 = scmp.ge.s32.totalorder %s22_s25, 6   ;;  %s2855_s11 = sld [smem:[#allocation19_spill]] }
 0x258   : > { %s2856_s13 = smov %s1955_s14  ;;  %s2857_s14 = smov %s2250_s10 }
 0x259   : > { %s2858_s15 = smov %s1963_s16  ;;  %s2859_s16 = smov %s1967_s17 }
 0x25a   : > { %s2860_s17 = smov %s2239_s8  ;;  %s2861_s18 = smov %s1975_s19 }
 0x25b   : > { %s2862_s19 = smov %s1979_s20  ;;  %s2863_s20 = smov %s2247_s3 }
 0x25c   : > { %s2864_s21 = smov %s1991_s23  ;;  %s2865_s22 = smov %s1995_s24 }
 0x25d   : > { %s2866_s23 = smov %s2855_s11  ;;  %s2867_s24 = smov %s2873_s30 }
 0x25e   :  { %21 = sbr.rel (!%p2751_p3) target bundleno = 16 (0x10), region = 94 }
 0x265   :  { %1355 = vsyncpa [#allocation3], 1 }
 0x266   :  { %1357 = vsyncpa [#allocation3 + $0x1], 1 }
 0x267   :  { %1358 = vsyncpa [#allocation6], 1 }
 0x268   :  { %1360 = vsyncpa [#allocation6 + $0x1], 1 }
 0x269   :  { %1361 = vsyncpa [#allocation4], 1 }
 0x26a   :  { %1363 = vsyncpa [#allocation4 + $0x1], 1 }

</bundles_post_ra>
